<compile_context>
chip_gen: v7x
topology: tpu7x:2x2x1
jax: 0.10.0
libtpu: 0.0.40
codegen_flags: <defaults>
</compile_context>

<pallas_src>
import math

import jax
import jax.numpy as jnp
from jax.experimental import pallas as pl
from jax.experimental.pallas import tpu as pltpu

EMBED = 32
HEADS = 4
HEAD_DIM = EMBED // HEADS

# masked_fill value from the reference (-1e-12), pre-divided by sqrt(embed)
# because the 1/sqrt(embed) scale is folded into Wq in the wrapper.
_MASK_FILL_SCALED = -1e-12 / math.sqrt(float(EMBED))


# ----------------------------------------------------------------------------
# Fused kernel: one grid step == one batch element
# ----------------------------------------------------------------------------
def _fused_attn_kernel(q_ref, k_ref, v_ref, mask_ref,
                       wq_ref, wk_ref, wv_ref, wfc_ref, bfc_ref, o_ref):
    q = q_ref[0]                      # (Lq, E)
    k = k_ref[0]                      # (Lk, E)
    v = v_ref[0]                      # (Lk, E)

    # Head projections as lane-dense (L, E) @ (E, E) block-diagonal matmuls.
    # wq_ref already carries the 1/sqrt(embed) softmax scale.
    qp = jnp.dot(q, wq_ref[...], preferred_element_type=jnp.float32)
    kp = jnp.dot(k, wk_ref[...], preferred_element_type=jnp.float32)
    vp = jnp.dot(v, wv_ref[...], preferred_element_type=jnp.float32)

    # Mask is head-invariant: compare once per batch element.
    masked = mask_ref[0, 0, :, :] == 0            # (Lq, Lk) bool

    head_outs = []
    for h in range(HEADS):                        # static unroll, H = 4
        sl = slice(h * HEAD_DIM, (h + 1) * HEAD_DIM)
        # energy / sqrt(embed)  (scale already folded into qp)
        e = jnp.dot(qp[:, sl], kp[:, sl].T, preferred_element_type=jnp.float32)
        e = jnp.where(masked, jnp.float32(_MASK_FILL_SCALED), e)
        # numerically stable softmax; denominator divide goes to the EUP
        mx = jnp.max(e, axis=-1, keepdims=True)
        p = jnp.exp(e - mx)
        denom = jnp.sum(p, axis=-1, keepdims=True)
        attn = p * pl.reciprocal(denom, approx=True)
        head_outs.append(jnp.dot(attn, vp[:, sl],
                                 preferred_element_type=jnp.float32))

    concat = jnp.concatenate(head_outs, axis=-1)  # (Lq, E), lane-dense
    # fc_out: x @ W_fc.T + b  (W_fc passed pre-transposed)
    o_ref[0] = (jnp.dot(concat, wfc_ref[...],
                        preferred_element_type=jnp.float32) + bfc_ref[...])


# ----------------------------------------------------------------------------
# Wrapper: builds block-diagonal / pre-transposed weights, single pallas_call
# ----------------------------------------------------------------------------
@jax.jit
def self_attention_forward(values, keys, query, mask, params):
    N, Lq, E = query.shape
    Lk = keys.shape[1]
    H = HEADS

    eye = jnp.eye(H, dtype=jnp.float32)
    # Same per-head (D, D) Linear weight applied to every head slot ->
    # block-diagonal (E, E); nn.Linear computes x @ W.T so transpose here.
    wq_bd = jnp.kron(eye, params["wq"].T) * jnp.float32(1.0 / math.sqrt(E))
    wk_bd = jnp.kron(eye, params["wk"].T)
    wv_bd = jnp.kron(eye, params["wv"].T)
    wfc_t = params["w_fc"].T                       # (E_in, E_out)
    b_fc = params["b_fc"]                          # (1, E)

    return pl.pallas_call(
        _fused_attn_kernel,
        out_shape=jax.ShapeDtypeStruct((N, Lq, E), jnp.float32),
        grid=(N,),
        in_specs=[
            pl.BlockSpec((1, Lq, E), lambda n: (n, 0, 0)),       # query
            pl.BlockSpec((1, Lk, E), lambda n: (n, 0, 0)),       # keys
            pl.BlockSpec((1, Lk, E), lambda n: (n, 0, 0)),       # values
            pl.BlockSpec((1, 1, Lq, Lk), lambda n: (n, 0, 0, 0)),  # mask
            pl.BlockSpec((E, E), lambda n: (0, 0)),              # Wq (scaled)
            pl.BlockSpec((E, E), lambda n: (0, 0)),              # Wk
            pl.BlockSpec((E, E), lambda n: (0, 0)),              # Wv
            pl.BlockSpec((E, E), lambda n: (0, 0)),              # W_fc.T
            pl.BlockSpec((1, E), lambda n: (0, 0)),              # b_fc
        ],
        out_specs=pl.BlockSpec((1, Lq, E), lambda n: (n, 0, 0)),
        compiler_params=pltpu.CompilerParams(
            dimension_semantics=("parallel",)),
    )(query, keys, values, mask, wq_bd, wk_bd, wv_bd, wfc_t, b_fc)


# ----------------------------------------------------------------------------
# Pure-JAX reference (mirrors the PyTorch forward exactly) for a sanity check
# ----------------------------------------------------------------------------
def reference_forward(values, keys, query, mask, params):
    N, Lq, E = query.shape
    Lk = keys.shape[1]
    H, D = HEADS, HEAD_DIM
    v = values.reshape(N, Lk, H, D) @ params["wv"].T
    k = keys.reshape(N, Lk, H, D) @ params["wk"].T
    q = query.reshape(N, Lq, H, D) @ params["wq"].T
    energy = jnp.einsum("nqhd,nkhd->nhqk", q, k, precision="highest")
    energy = jnp.where(mask == 0, jnp.float32(-1e-12), energy)
    attn = jax.nn.softmax(energy / jnp.sqrt(jnp.float32(E)), axis=3)
    out = jnp.einsum("nhql,nlhd->nqhd", attn, v, precision="highest")
    out = out.reshape(N, Lq, H * D)
    return out @ params["w_fc"].T + params["b_fc"][0]


if __name__ == "__main__":
    key = jax.random.PRNGKey(0)
    k_v, k_k, k_q, k_wq, k_wk, k_wv, k_wfc, k_bfc = jax.random.split(key, 8)

    N, L, E = 2, 8, EMBED
    values = jax.random.normal(k_v, (N, L, E), dtype=jnp.float32)
    keys = jax.random.normal(k_k, (N, L, E), dtype=jnp.float32)
    query = jax.random.normal(k_q, (N, L, E), dtype=jnp.float32)
    # causal mask, broadcast over heads: (N, 1, Lq, Lk)
    mask = jnp.broadcast_to(
        jnp.tril(jnp.ones((L, L), dtype=jnp.float32))[None, None], (N, 1, L, L)
    )

    D = HEAD_DIM
    params = {
        "wq": 0.1 * jax.random.normal(k_wq, (D, D), dtype=jnp.float32),
        "wk": 0.1 * jax.random.normal(k_wk, (D, D), dtype=jnp.float32),
        "wv": 0.1 * jax.random.normal(k_wv, (D, D), dtype=jnp.float32),
        "w_fc": 0.1 * jax.random.normal(k_wfc, (E, E), dtype=jnp.float32),
        "b_fc": 0.01 * jax.random.normal(k_bfc, (1, E), dtype=jnp.float32),
    }

    out = self_attention_forward(values, keys, query, mask, params)
    out = jax.block_until_ready(out)

    ref = reference_forward(values, keys, query, mask, params)
    assert out.shape == (N, L, E)
    assert jnp.allclose(out, ref, rtol=1e-2, atol=1e-2), (
        f"max abs diff {jnp.max(jnp.abs(out - ref))}"
    )
    print("KERNEL_OK")
</pallas_src>

<mosaic_0001>
module attributes {stable_mosaic.version = 11 : i64} {
  func.func @_fused_attn_kernel(%arg0: i32, %arg1: memref<1x8x32xf32, #tpu.memory_space<vmem>>, %arg2: memref<1x8x32xf32, #tpu.memory_space<vmem>>, %arg3: memref<1x8x32xf32, #tpu.memory_space<vmem>>, %arg4: memref<1x1x8x8xf32, #tpu.memory_space<vmem>>, %arg5: memref<32x32xf32, #tpu.memory_space<vmem>>, %arg6: memref<32x32xf32, #tpu.memory_space<vmem>>, %arg7: memref<32x32xf32, #tpu.memory_space<vmem>>, %arg8: memref<32x32xf32, #tpu.memory_space<vmem>>, %arg9: memref<1x32xf32, #tpu.memory_space<vmem>>, %arg10: memref<1x8x32xf32, #tpu.memory_space<vmem>>) attributes {dimension_semantics = [#tpu.dimension_semantics<parallel>], iteration_bounds = array<i64: 2>, scalar_prefetch = 0 : i64, scratch_operands = 0 : i64, tpu.core_type = #tpu.core_type<tc>, window_params = [{transform_indices = @transform_0, window_bounds = array<i64: 1, 8, 32>}, {transform_indices = @transform_1, window_bounds = array<i64: 1, 8, 32>}, {transform_indices = @transform_2, window_bounds = array<i64: 1, 8, 32>}, {transform_indices = @transform_3, window_bounds = array<i64: 1, 1, 8, 8>}, {pipeline_mode = #tpu.pipeline_mode<synchronous>, transform_indices = @transform_4, window_bounds = array<i64: 32, 32>}, {pipeline_mode = #tpu.pipeline_mode<synchronous>, transform_indices = @transform_5, window_bounds = array<i64: 32, 32>}, {pipeline_mode = #tpu.pipeline_mode<synchronous>, transform_indices = @transform_6, window_bounds = array<i64: 32, 32>}, {pipeline_mode = #tpu.pipeline_mode<synchronous>, transform_indices = @transform_7, window_bounds = array<i64: 32, 32>}, {pipeline_mode = #tpu.pipeline_mode<synchronous>, transform_indices = @transform_8, window_bounds = array<i64: 1, 32>}, {transform_indices = @transform_9, window_bounds = array<i64: 1, 8, 32>}]} {
    %c0 = arith.constant 0 : index
    %c0_0 = arith.constant 0 : index
    %c0_1 = arith.constant 0 : index
    %0 = vector.load %arg1[%c0, %c0_0, %c0_1] : memref<1x8x32xf32, #tpu.memory_space<vmem>>, vector<1x8x32xf32>
    %1 = vector.shape_cast %0 : vector<1x8x32xf32> to vector<8x32xf32>
    %c0_2 = arith.constant 0 : index
    %c0_3 = arith.constant 0 : index
    %c0_4 = arith.constant 0 : index
    %2 = vector.load %arg2[%c0_2, %c0_3, %c0_4] : memref<1x8x32xf32, #tpu.memory_space<vmem>>, vector<1x8x32xf32>
    %3 = vector.shape_cast %2 : vector<1x8x32xf32> to vector<8x32xf32>
    %c0_5 = arith.constant 0 : index
    %c0_6 = arith.constant 0 : index
    %c0_7 = arith.constant 0 : index
    %4 = vector.load %arg3[%c0_5, %c0_6, %c0_7] : memref<1x8x32xf32, #tpu.memory_space<vmem>>, vector<1x8x32xf32>
    %5 = vector.shape_cast %4 : vector<1x8x32xf32> to vector<8x32xf32>
    %c0_8 = arith.constant 0 : index
    %c0_9 = arith.constant 0 : index
    %6 = vector.load %arg5[%c0_8, %c0_9] : memref<32x32xf32, #tpu.memory_space<vmem>>, vector<32x32xf32>
    %cst = arith.constant dense<0.000000e+00> : vector<8x32xf32>
    %7 = tpu.matmul %1, %6, %cst {dimension_numbers = #tpu.dot_dimension_numbers<[1], [0], [0], [1], [0, 0, 1, 1], [], []>} : vector<8x32xf32>, vector<32x32xf32>, vector<8x32xf32> -> vector<8x32xf32>
    %c0_10 = arith.constant 0 : index
    %c0_11 = arith.constant 0 : index
    %8 = vector.load %arg6[%c0_10, %c0_11] : memref<32x32xf32, #tpu.memory_space<vmem>>, vector<32x32xf32>
    %cst_12 = arith.constant dense<0.000000e+00> : vector<8x32xf32>
    %9 = tpu.matmul %3, %8, %cst_12 {dimension_numbers = #tpu.dot_dimension_numbers<[1], [0], [0], [1], [0, 0, 1, 1], [], []>} : vector<8x32xf32>, vector<32x32xf32>, vector<8x32xf32> -> vector<8x32xf32>
    %c0_13 = arith.constant 0 : index
    %c0_14 = arith.constant 0 : index
    %10 = vector.load %arg7[%c0_13, %c0_14] : memref<32x32xf32, #tpu.memory_space<vmem>>, vector<32x32xf32>
    %cst_15 = arith.constant dense<0.000000e+00> : vector<8x32xf32>
    %11 = tpu.matmul %5, %10, %cst_15 {dimension_numbers = #tpu.dot_dimension_numbers<[1], [0], [0], [1], [0, 0, 1, 1], [], []>} : vector<8x32xf32>, vector<32x32xf32>, vector<8x32xf32> -> vector<8x32xf32>
    %c0_16 = arith.constant 0 : index
    %c0_17 = arith.constant 0 : index
    %c0_18 = arith.constant 0 : index
    %c0_19 = arith.constant 0 : index
    %12 = vector.load %arg4[%c0_16, %c0_17, %c0_18, %c0_19] : memref<1x1x8x8xf32, #tpu.memory_space<vmem>>, vector<1x1x8x8xf32>
    %13 = vector.shape_cast %12 : vector<1x1x8x8xf32> to vector<8x8xf32>
    %cst_20 = arith.constant 0.000000e+00 : f32
    %14 = vector.broadcast %cst_20 : f32 to vector<8x8xf32>
    %15 = arith.cmpf oeq, %13, %14 : vector<8x8xf32>
    %16 = vector.extract_strided_slice %7 {offsets = [0, 0], sizes = [8, 8], strides = [1, 1]} : vector<8x32xf32> to vector<8x8xf32>
    %17 = vector.extract_strided_slice %9 {offsets = [0, 0], sizes = [8, 8], strides = [1, 1]} : vector<8x32xf32> to vector<8x8xf32>
    %18 = tpu.transpose %17, [1, 0] : vector<8x8xf32> -> vector<8x8xf32>
    %cst_21 = arith.constant dense<0.000000e+00> : vector<8x8xf32>
    %19 = tpu.matmul %16, %18, %cst_21 {dimension_numbers = #tpu.dot_dimension_numbers<[1], [0], [0], [1], [0, 0, 1, 1], [], []>} : vector<8x8xf32>, vector<8x8xf32>, vector<8x8xf32> -> vector<8x8xf32>
    %cst_22 = arith.constant -1.76776698E-13 : f32
    %20 = vector.broadcast %cst_22 : f32 to vector<8x8xf32>
    %21 = arith.select %15, %20, %19 : vector<8x8xi1>, vector<8x8xf32>
    %cst_23 = arith.constant dense<0xFF800000> : vector<8xf32>
    %22 = vector.multi_reduction <maximumf>, %21, %cst_23 [1] : vector<8x8xf32> to vector<8xf32>
    %23 = vector.shape_cast %22 : vector<8xf32> to vector<8x1xf32>
    %24 = vector.broadcast %23 : vector<8x1xf32> to vector<8x8xf32>
    %25 = arith.subf %21, %24 : vector<8x8xf32>
    %26 = math.exp %25 : vector<8x8xf32>
    %cst_24 = arith.constant dense<0.000000e+00> : vector<8xf32>
    %27 = vector.multi_reduction <add>, %26, %cst_24 [1] : vector<8x8xf32> to vector<8xf32>
    %28 = vector.shape_cast %27 : vector<8xf32> to vector<8x1xf32>
    %29 = tpu.reciprocal %28 {approx = true} : vector<8x1xf32> -> vector<8x1xf32>
    %30 = vector.broadcast %29 : vector<8x1xf32> to vector<8x8xf32>
    %31 = arith.mulf %26, %30 : vector<8x8xf32>
    %32 = vector.extract_strided_slice %11 {offsets = [0, 0], sizes = [8, 8], strides = [1, 1]} : vector<8x32xf32> to vector<8x8xf32>
    %cst_25 = arith.constant dense<0.000000e+00> : vector<8x8xf32>
    %33 = tpu.matmul %31, %32, %cst_25 {dimension_numbers = #tpu.dot_dimension_numbers<[1], [0], [0], [1], [0, 0, 1, 1], [], []>} : vector<8x8xf32>, vector<8x8xf32>, vector<8x8xf32> -> vector<8x8xf32>
    %34 = vector.extract_strided_slice %7 {offsets = [0, 8], sizes = [8, 8], strides = [1, 1]} : vector<8x32xf32> to vector<8x8xf32>
    %35 = vector.extract_strided_slice %9 {offsets = [0, 8], sizes = [8, 8], strides = [1, 1]} : vector<8x32xf32> to vector<8x8xf32>
    %36 = tpu.transpose %35, [1, 0] : vector<8x8xf32> -> vector<8x8xf32>
    %cst_26 = arith.constant dense<0.000000e+00> : vector<8x8xf32>
    %37 = tpu.matmul %34, %36, %cst_26 {dimension_numbers = #tpu.dot_dimension_numbers<[1], [0], [0], [1], [0, 0, 1, 1], [], []>} : vector<8x8xf32>, vector<8x8xf32>, vector<8x8xf32> -> vector<8x8xf32>
    %cst_27 = arith.constant -1.76776698E-13 : f32
    %38 = vector.broadcast %cst_27 : f32 to vector<8x8xf32>
    %39 = arith.select %15, %38, %37 : vector<8x8xi1>, vector<8x8xf32>
    %cst_28 = arith.constant dense<0xFF800000> : vector<8xf32>
    %40 = vector.multi_reduction <maximumf>, %39, %cst_28 [1] : vector<8x8xf32> to vector<8xf32>
    %41 = vector.shape_cast %40 : vector<8xf32> to vector<8x1xf32>
    %42 = vector.broadcast %41 : vector<8x1xf32> to vector<8x8xf32>
    %43 = arith.subf %39, %42 : vector<8x8xf32>
    %44 = math.exp %43 : vector<8x8xf32>
    %cst_29 = arith.constant dense<0.000000e+00> : vector<8xf32>
    %45 = vector.multi_reduction <add>, %44, %cst_29 [1] : vector<8x8xf32> to vector<8xf32>
    %46 = vector.shape_cast %45 : vector<8xf32> to vector<8x1xf32>
    %47 = tpu.reciprocal %46 {approx = true} : vector<8x1xf32> -> vector<8x1xf32>
    %48 = vector.broadcast %47 : vector<8x1xf32> to vector<8x8xf32>
    %49 = arith.mulf %44, %48 : vector<8x8xf32>
    %50 = vector.extract_strided_slice %11 {offsets = [0, 8], sizes = [8, 8], strides = [1, 1]} : vector<8x32xf32> to vector<8x8xf32>
    %cst_30 = arith.constant dense<0.000000e+00> : vector<8x8xf32>
    %51 = tpu.matmul %49, %50, %cst_30 {dimension_numbers = #tpu.dot_dimension_numbers<[1], [0], [0], [1], [0, 0, 1, 1], [], []>} : vector<8x8xf32>, vector<8x8xf32>, vector<8x8xf32> -> vector<8x8xf32>
    %52 = vector.extract_strided_slice %7 {offsets = [0, 16], sizes = [8, 8], strides = [1, 1]} : vector<8x32xf32> to vector<8x8xf32>
    %53 = vector.extract_strided_slice %9 {offsets = [0, 16], sizes = [8, 8], strides = [1, 1]} : vector<8x32xf32> to vector<8x8xf32>
    %54 = tpu.transpose %53, [1, 0] : vector<8x8xf32> -> vector<8x8xf32>
    %cst_31 = arith.constant dense<0.000000e+00> : vector<8x8xf32>
    %55 = tpu.matmul %52, %54, %cst_31 {dimension_numbers = #tpu.dot_dimension_numbers<[1], [0], [0], [1], [0, 0, 1, 1], [], []>} : vector<8x8xf32>, vector<8x8xf32>, vector<8x8xf32> -> vector<8x8xf32>
    %cst_32 = arith.constant -1.76776698E-13 : f32
    %56 = vector.broadcast %cst_32 : f32 to vector<8x8xf32>
    %57 = arith.select %15, %56, %55 : vector<8x8xi1>, vector<8x8xf32>
    %cst_33 = arith.constant dense<0xFF800000> : vector<8xf32>
    %58 = vector.multi_reduction <maximumf>, %57, %cst_33 [1] : vector<8x8xf32> to vector<8xf32>
    %59 = vector.shape_cast %58 : vector<8xf32> to vector<8x1xf32>
    %60 = vector.broadcast %59 : vector<8x1xf32> to vector<8x8xf32>
    %61 = arith.subf %57, %60 : vector<8x8xf32>
    %62 = math.exp %61 : vector<8x8xf32>
    %cst_34 = arith.constant dense<0.000000e+00> : vector<8xf32>
    %63 = vector.multi_reduction <add>, %62, %cst_34 [1] : vector<8x8xf32> to vector<8xf32>
    %64 = vector.shape_cast %63 : vector<8xf32> to vector<8x1xf32>
    %65 = tpu.reciprocal %64 {approx = true} : vector<8x1xf32> -> vector<8x1xf32>
    %66 = vector.broadcast %65 : vector<8x1xf32> to vector<8x8xf32>
    %67 = arith.mulf %62, %66 : vector<8x8xf32>
    %68 = vector.extract_strided_slice %11 {offsets = [0, 16], sizes = [8, 8], strides = [1, 1]} : vector<8x32xf32> to vector<8x8xf32>
    %cst_35 = arith.constant dense<0.000000e+00> : vector<8x8xf32>
    %69 = tpu.matmul %67, %68, %cst_35 {dimension_numbers = #tpu.dot_dimension_numbers<[1], [0], [0], [1], [0, 0, 1, 1], [], []>} : vector<8x8xf32>, vector<8x8xf32>, vector<8x8xf32> -> vector<8x8xf32>
    %70 = vector.extract_strided_slice %7 {offsets = [0, 24], sizes = [8, 8], strides = [1, 1]} : vector<8x32xf32> to vector<8x8xf32>
    %71 = vector.extract_strided_slice %9 {offsets = [0, 24], sizes = [8, 8], strides = [1, 1]} : vector<8x32xf32> to vector<8x8xf32>
    %72 = tpu.transpose %71, [1, 0] : vector<8x8xf32> -> vector<8x8xf32>
    %cst_36 = arith.constant dense<0.000000e+00> : vector<8x8xf32>
    %73 = tpu.matmul %70, %72, %cst_36 {dimension_numbers = #tpu.dot_dimension_numbers<[1], [0], [0], [1], [0, 0, 1, 1], [], []>} : vector<8x8xf32>, vector<8x8xf32>, vector<8x8xf32> -> vector<8x8xf32>
    %cst_37 = arith.constant -1.76776698E-13 : f32
    %74 = vector.broadcast %cst_37 : f32 to vector<8x8xf32>
    %75 = arith.select %15, %74, %73 : vector<8x8xi1>, vector<8x8xf32>
    %cst_38 = arith.constant dense<0xFF800000> : vector<8xf32>
    %76 = vector.multi_reduction <maximumf>, %75, %cst_38 [1] : vector<8x8xf32> to vector<8xf32>
    %77 = vector.shape_cast %76 : vector<8xf32> to vector<8x1xf32>
    %78 = vector.broadcast %77 : vector<8x1xf32> to vector<8x8xf32>
    %79 = arith.subf %75, %78 : vector<8x8xf32>
    %80 = math.exp %79 : vector<8x8xf32>
    %cst_39 = arith.constant dense<0.000000e+00> : vector<8xf32>
    %81 = vector.multi_reduction <add>, %80, %cst_39 [1] : vector<8x8xf32> to vector<8xf32>
    %82 = vector.shape_cast %81 : vector<8xf32> to vector<8x1xf32>
    %83 = tpu.reciprocal %82 {approx = true} : vector<8x1xf32> -> vector<8x1xf32>
    %84 = vector.broadcast %83 : vector<8x1xf32> to vector<8x8xf32>
    %85 = arith.mulf %80, %84 : vector<8x8xf32>
    %86 = vector.extract_strided_slice %11 {offsets = [0, 24], sizes = [8, 8], strides = [1, 1]} : vector<8x32xf32> to vector<8x8xf32>
    %cst_40 = arith.constant dense<0.000000e+00> : vector<8x8xf32>
    %87 = tpu.matmul %85, %86, %cst_40 {dimension_numbers = #tpu.dot_dimension_numbers<[1], [0], [0], [1], [0, 0, 1, 1], [], []>} : vector<8x8xf32>, vector<8x8xf32>, vector<8x8xf32> -> vector<8x8xf32>
    %88 = tpu.concatenate %33, %51, %69, %87 in 1 : vector<8x8xf32>, vector<8x8xf32>, vector<8x8xf32>, vector<8x8xf32> -> vector<8x32xf32>
    %c0_41 = arith.constant 0 : index
    %c0_42 = arith.constant 0 : index
    %89 = vector.load %arg8[%c0_41, %c0_42] : memref<32x32xf32, #tpu.memory_space<vmem>>, vector<32x32xf32>
    %cst_43 = arith.constant dense<0.000000e+00> : vector<8x32xf32>
    %90 = tpu.matmul %88, %89, %cst_43 {dimension_numbers = #tpu.dot_dimension_numbers<[1], [0], [0], [1], [0, 0, 1, 1], [], []>} : vector<8x32xf32>, vector<32x32xf32>, vector<8x32xf32> -> vector<8x32xf32>
    %c0_44 = arith.constant 0 : index
    %c0_45 = arith.constant 0 : index
    %91 = vector.load %arg9[%c0_44, %c0_45] : memref<1x32xf32, #tpu.memory_space<vmem>>, vector<1x32xf32>
    %92 = vector.broadcast %91 : vector<1x32xf32> to vector<8x32xf32>
    %93 = arith.addf %90, %92 : vector<8x32xf32>
    %c0_46 = arith.constant 0 : index
    %c0_47 = arith.constant 0 : index
    %c0_48 = arith.constant 0 : index
    %94 = vector.load %arg10[%c0_46, %c0_47, %c0_48] : memref<1x8x32xf32, #tpu.memory_space<vmem>>, vector<1x8x32xf32>
    %95 = vector.shape_cast %94 : vector<1x8x32xf32> to vector<8x32xf32>
    %96 = vector.shape_cast %93 : vector<8x32xf32> to vector<1x8x32xf32>
    tpu.vector_store %arg10[%c0_46, %c0_47, %c0_48], %96 {strides = array<i32>} : memref<1x8x32xf32, #tpu.memory_space<vmem>>, vector<1x8x32xf32>,
    return
  }
  func.func @transform_0(%arg0: i32) -> (i32, i32, i32) {
    %c0_i32 = arith.constant 0 : i32
    %c0_i32_0 = arith.constant 0 : i32
    %c0_i32_1 = arith.constant 0 : i32
    return %arg0, %c0_i32, %c0_i32_0 : i32, i32, i32
  }
  func.func @transform_1(%arg0: i32) -> (i32, i32, i32) {
    %c0_i32 = arith.constant 0 : i32
    %c0_i32_0 = arith.constant 0 : i32
    %c0_i32_1 = arith.constant 0 : i32
    return %arg0, %c0_i32, %c0_i32_0 : i32, i32, i32
  }
  func.func @transform_2(%arg0: i32) -> (i32, i32, i32) {
    %c0_i32 = arith.constant 0 : i32
    %c0_i32_0 = arith.constant 0 : i32
    %c0_i32_1 = arith.constant 0 : i32
    return %arg0, %c0_i32, %c0_i32_0 : i32, i32, i32
  }
  func.func @transform_3(%arg0: i32) -> (i32, i32, i32, i32) {
    %c0_i32 = arith.constant 0 : i32
    %c0_i32_0 = arith.constant 0 : i32
    %c0_i32_1 = arith.constant 0 : i32
    %c0_i32_2 = arith.constant 0 : i32
    return %arg0, %c0_i32, %c0_i32_0, %c0_i32_1 : i32, i32, i32, i32
  }
  func.func @transform_4(%arg0: i32) -> (i32, i32) {
    %c0_i32 = arith.constant 0 : i32
    %c0_i32_0 = arith.constant 0 : i32
    %c0_i32_1 = arith.constant 0 : i32
    return %c0_i32, %c0_i32_0 : i32, i32
  }
  func.func @transform_5(%arg0: i32) -> (i32, i32) {
    %c0_i32 = arith.constant 0 : i32
    %c0_i32_0 = arith.constant 0 : i32
    %c0_i32_1 = arith.constant 0 : i32
    return %c0_i32, %c0_i32_0 : i32, i32
  }
  func.func @transform_6(%arg0: i32) -> (i32, i32) {
    %c0_i32 = arith.constant 0 : i32
    %c0_i32_0 = arith.constant 0 : i32
    %c0_i32_1 = arith.constant 0 : i32
    return %c0_i32, %c0_i32_0 : i32, i32
  }
  func.func @transform_7(%arg0: i32) -> (i32, i32) {
    %c0_i32 = arith.constant 0 : i32
    %c0_i32_0 = arith.constant 0 : i32
    %c0_i32_1 = arith.constant 0 : i32
    return %c0_i32, %c0_i32_0 : i32, i32
  }
  func.func @transform_8(%arg0: i32) -> (i32, i32) {
    %c0_i32 = arith.constant 0 : i32
    %c0_i32_0 = arith.constant 0 : i32
    %c0_i32_1 = arith.constant 0 : i32
    return %c0_i32, %c0_i32_0 : i32, i32
  }
  func.func @transform_9(%arg0: i32) -> (i32, i32, i32) {
    %c0_i32 = arith.constant 0 : i32
    %c0_i32_0 = arith.constant 0 : i32
    %c0_i32_1 = arith.constant 0 : i32
    return %arg0, %c0_i32, %c0_i32_0 : i32, i32, i32
  }
}

</mosaic_0001>

<bundles_post_ra>
// kernel: self_attention_forward.1
= control target key start
LH: loop header
LB: loop body
LE: loop exit
PB: predicated region body
PF: predicated region fallthrough
CT: control target
= control target key end

     0   :  { %14 = vsyncpa [#allocation3], 0  ;;  %s2104_s0 = inlined_call_operand.vmem [shape: f32[2,8,32], index: 0, kind: input, shape index: {}]   ;;  %s2105_s1 = inlined_call_operand.vmem [shape: f32[2,8,32], index: 1, kind: input, shape index: {}]   ;;  %s2106_s2 = inlined_call_operand.vmem [shape: f32[2,8,32], index: 2, kind: input, shape index: {}]   ;;  %s2107_s3 = inlined_call_operand.vmem [shape: f32[2,1,8,8], index: 3, kind: input, shape index: {}]   ;;  %s2108_s4 = inlined_call_operand.vmem [shape: f32[32,32], index: 4, kind: input, shape index: {}]   ;;  %s2109_s5 = inlined_call_operand.vmem [shape: f32[32,32], index: 5, kind: input, shape index: {}]   ;;  %s2110_s6 = inlined_call_operand.vmem [shape: f32[32,32], index: 6, kind: input, shape index: {}]   ;;  %s2111_s7 = inlined_call_operand.vmem [shape: f32[32,32], index: 7, kind: input, shape index: {}]   ;;  %s2112_s8 = inlined_call_operand.vmem [shape: f32[1,32], index: 8, kind: input, shape index: {}]   ;;  %s2113_s9 = inlined_call_operand.hbm [shape: f32[2,8,32], index: 9, kind: output, shape index: {}]  }
   0x1   :  { %16 = vsyncpa [#allocation3 + $0x1], 0  ;;  %s1850_s30 = smov 0   ;;  %s1852_s10 = smov 0  }
   0x2   :  { %s1854_s11 = smov 0   ;;  %s1856_s12 = smov 0  }
   0x3 LB: > { %s1871_s13 = sadd.s32 4294967295, %s1788_s12   ;;  %s1488_s14 = sadd.s32 4294967294, %s1788_s12   ;;  %s1788_s12 = sphi %s1856_s12, %s2121_s12   ;;  %s1784_s11 = sphi %s1854_s11, %s2120_s11   ;;  %s1780_s10 = sphi %s1852_s10, %s2119_s10   ;;  %s1776_s30 = sphi %s1850_s30, %s2118_s30  }
   0x4   : > { %s1875_s15 = sadd.s32 1, %s1788_s12   ;;  %s238_s16 = sadd.s32 1, %s1784_s11 }
   0x5   : > { %s235_s17 = ssub.s32 %s1788_s12, %s1875_s15  ;;  %p248_p0 = scmp.ne.s32.totalorder %s1784_s11, %s1780_s10 }
   0x6   : > { %p236_p1 = scmp.eq.s32.totalorder %s235_s17, 0  ;;  %p249_p2 = scmp.eq.s32.totalorder %s1871_s13, 1 }
   0x7   : > { %p254_p3 = scmp.ne.s32.totalorder %s1780_s10, %s1776_s30  ;;  %p255_p4 = scmp.eq.s32.totalorder %s1488_s14, 1 }
   0x8   : > { %s1886_s18 = scalar_select %p236_p1, %s1784_s11, %s238_s16  }
   0x9   : > { %p1888_p5 = por %p249_p2, %p248_p0  ;;  %p1892_p6 = por %p255_p4, %p254_p3 }
   0xa   : > { %p1491_p7 = scmp.ge.s32.totalorder %s1788_s12, 1  ;;  %p316_p8 = scmp.lt.s32.totalorder %s1788_s12, 3 }
   0xc   : > { %p317_p9 = pnand %p1491_p7, %p316_p8 }
   0xd   : > { %v460_v0 = vld [vmem:[%s2109_s5] sm:$0xff] (!%p317_p9)  ;;  %v461_v1 = vld [vmem:[%s2109_s5 + $0x8] sm:$0xff] (!%p317_p9)  ;;  %v1790_v3 = vmov (!%p317_p9), 0.0|0.0   ;;  %v462_v6 = vld [vmem:[%s2109_s5 + $0x10] sm:$0xff] (!%p317_p9)  ;;  %p363_p10 = scmp.lt.s32.totalorder (!%p317_p9), %s1871_s13, 1  ;;  %vm1791_vm0 = vmmov (!%p317_p9), 0  }
   0xe   : > { %320 = sbr.rel (%p317_p9) target bundleno = 1920 (0x780), region = 56  ;;  %v382_v2 = vld [vmem:[%s2108_s4] sm:$0xff] (!%p317_p9)  ;;  %1644 = vmatprep.subr.bf16.mxu1 (!%p317_p9), %v1790_v3  ;;  %v1645_v4 = vpack.c.bf16 (!%p317_p9), %v461_v1, %v460_v0  ;;  %1638 = vmatprep.subr.bf16.mxu0 (!%p317_p9), %v1790_v3  ;;  %v383_v5 = vld [vmem:[%s2108_s4 + $0x8] sm:$0xff] (!%p317_p9)  ;;  %v463_v7 = vld [vmem:[%s2109_s5 + $0x18] sm:$0xff] (!%p317_p9)  ;;  %v1792_v9 = vmov (!%p317_p9), 0.0   ;;  %vm386_vm1 = vcmask (!%p317_p9), 261120  }
   0xf   : > { %v1639_v8 = vpack.c.bf16 (!%p317_p9), %v383_v5, %v382_v2  ;;  %1573 = vmatprep.mubr.msk.f32.mxu1 (!%p317_p9), %vm1791_vm0, %v1792_v9  ;;  %v384_v10 = vld [vmem:[%s2108_s4 + $0x10] sm:$0xff] (!%p317_p9)  ;;  %v385_v11 = vld [vmem:[%s2108_s4 + $0x18] sm:$0xff] (!%p317_p9)  ;;  %1562 = vmatprep.mubr.msk.f32.mxu0 (!%p317_p9), %vm1791_vm0, %v1792_v9  ;;  %v1648_v12 = vpack.c.bf16 (!%p317_p9), %v463_v7, %v462_v6  ;;  %vm616_vm2 = vcmask (!%p317_p9), 64512   ;;  %s1793_s21 = smov (!%p317_p9), 120   ;;  %s1794_s22 = smov (!%p317_p9), 112   ;;  %v537_v20 = vld [vmem:[%s2110_s6] sm:$0xff] (!%p317_p9) }
  0x10   : > { %1646 = vmatpush3.bf16.msra.mxu1 (!%p317_p9), %v1645_v4  ;;  %v1642_v13 = vpack.c.bf16 (!%p317_p9), %v385_v11, %v384_v10  ;;  %s2114_s23 = smov (!%p317_p9), 104   ;;  %v538_v21 = vld [vmem:[%s2110_s6 + $0x8] sm:$0xff] (!%p317_p9)  ;;  %v539_v22 = vld [vmem:[%s2110_s6 + $0x10] sm:$0xff] (!%p317_p9)  ;;  %v540_v24 = vld [vmem:[%s2110_s6 + $0x18] sm:$0xff] (!%p317_p9)  ;;  %s1796_s27 = smov (!%p317_p9), 8   ;;  %vm1290_vm4 = vcmask (!%p317_p9), 130048  }
  0x11   : > { %1640 = vmatpush3.bf16.msra.mxu0 (!%p317_p9), %v1639_v8  ;;  %1647 = vmatprep.subr.bf16.mxu1 (!%p317_p9), %v1790_v3  ;;  %v1651_v23 = vpack.c.bf16 (!%p317_p9), %v538_v21, %v537_v20  ;;  %v1654_v25 = vpack.c.bf16 (!%p317_p9), %v540_v24, %v539_v22  ;;  %s1797_s28 = smov (!%p317_p9), 16   ;;  %vm1292_vm5 = vcmask (!%p317_p9), 195584   ;;  %s1515_s14 = sshll.u32 (!%p317_p9), %s1871_s13, 7 }
  0x12   : > { %1641 = vmatprep.subr.bf16.mxu0 (!%p317_p9), %v1790_v3 }
  0x14   : > { %1649 = vmatpush3.bf16.msra.mxu1 (!%p317_p9), %v1648_v12 }
  0x15   : > { %s364_s25 = scalar_select %p363_p10, %s1871_s13, 1  ;;  %1643 = vmatpush3.bf16.msra.mxu0 %v1642_v13  ;;  %1587 = vmatprep.subr.mxu1 %v1792_v9 }
  0x16   : > { %1650 = vmatprep.subr.bf16.mxu0 %v1790_v3  ;;  %s1799_s13 = smov [#allocation2]  }
  0x17   : > { %s1932_s26 = sshll.u32 %s364_s25, 3 }
  0x18   : > { %s370_s29 = scalar_lea.vmem %s2105_s1, %s1932_s26  ;;  %s366_s17 = scalar_lea.vmem %s2104_s0, %s1932_s26 }
  0x19   : > { %v380_v14 = vld [vmem:[%s370_s29] sm:$0xff]  ;;  %s374_s25 = scalar_lea.vmem %s2106_s2, %s1932_s26  ;;  %s378_s29 = scalar_lea.vmem %s2107_s3, %s1932_s26 }
  0x1a   : > { %v379_v15 = vld [vmem:[%s366_s17] sm:$0xff]  ;;  %1574 = vmatmul.mubr.msk.f32.vlgmr.msra.gmra.mrb[0].mxu1 %vm386_vm1, %v380_v14  ;;  %s2117_s26 = smov 104  }
  0x1b   : > { %1563 = vmatmul.mubr.msk.f32.vlgmr.msra.gmra.mrb[0].mxu0 %vm386_vm1, %v379_v15  ;;  %1589 = vmatprep.mubr.msk.f32.mxu1 %vm1791_vm0, %v1792_v9  ;;  %v381_v26 = vld [vmem:[%s374_s25] sm:$0xff] }
  0x1c   : > { %1584 = vmatprep.mubr.msk.f32.mxu0 %vm1791_vm0, %v1792_v9  ;;  %1652 = vmatpush3.bf16.msra.mxu0 %v1651_v23  ;;  %v614_v27 = vld [vmem:[%s378_s29] sm:$0xff]  ;;  %s1798_s29 = smov 24  }
  0x1d   : > { %1653 = vmatprep.subr.bf16.mxu0 %v1790_v3  ;;  %vm615_vm3 = vcmp.eq.f32.partialorder %v614_v27, 0.0  ;;  %v1294_v27 = vld [vmem:[%s2111_s7] sm:$0xff] }
  0x20   : > { %1655 = vmatpush3.bf16.msra.mxu0 %v1654_v25 }
  0x21   : > { %1607 = vmatprep.subr.mxu0 %v1792_v9 }
  0x23   : > { %1585 = vmatmul.mubr.msk.f32.vlgmr.msra.gmra.mrb[2].mxu0 %vm386_vm1, %v381_v26 }
  0x24   : > { %1609 = vmatprep.mubr.msk.f32.mxu0 %vm1791_vm0, %v1792_v9 }
  0xed   : > { %v533_v16 = vpop.f32.mrb[0].mxu1 }
  0xee   : > { %780 = vrot.lane.b32.xlu1 %v533_v16, %s1793_s21  ;;  %v1575_v17 = vpop.f32.mrb[1].mxu1  ;;  %1588 = vmatpush3.xpose.msk.msra.mxu1 %vm616_vm2, %v533_v16  ;;  %v456_v18 = vpop.f32.mrb[0].mxu0 }
  0xef   : > { %v1564_v19 = vpop.f32.mrb[1].mxu0  ;;  %1592 = vmatprep.subr.mxu1 %v1792_v9 }
  0xf1   : > { %1590 = vmatmul.mubr.msk.f32.vlgmr.msra.gmra.mrb[2].mxu1 %vm616_vm2, %v456_v18 }
  0xf2   : > { %778 = vrot.lane.b32.xlu1 %v456_v18, %s1793_s21  ;;  %1594 = vmatprep.mubr.msk.f32.mxu1 %vm1791_vm0, %v1792_v9 }
  0xf6   : > { %945 = vrot.lane.b32.xlu1 %v456_v18, %s1794_s22  ;;  %v1988_v37 = vpop.f32.mrb[2].mxu0 }
  0xf7   : > { %v1586_v38 = vpop.f32.mrb[3].mxu0  ;;  %1593 = vmatpush3.msra.mxu1 %v1988_v37 }
  0xf8   : > { %1597 = vmatprep.subr.mxu1 %v1792_v9 }
  0xfa   : > { %1113 = vrot.lane.b32.xlu1 %v533_v16, %s2114_s23 }
  0xfe   : > { %1111 = vrot.lane.b32.xlu1 %v456_v18, %s2114_s23 }
 0x160   : > { %v781_v39 = vpop.permute.xlu1 %780 }
 0x164   : > { %v779_v40 = vpop.permute.xlu1 %778 }
 0x168   : > { %v946_v41 = vpop.permute.xlu1 %945 }
 0x16c   : > { %v1114_v44 = vpop.permute.xlu1 %1113 }
 0x170   : > { %v1112_v46 = vpop.permute.xlu1 %1111 }
 0x1c4   : > { %v689_v28 = vpop.f32.mrb[2].mxu1 }
 0x1c5   : > { %v693_v29 = vsel %vm615_vm3, -1.767767e-13, %v689_v28  ;;  %v1591_v30 = vpop.f32.mrb[3].mxu1  ;;  %v1295_v28 = vld [vmem:[%s2111_s7 + $0x8] sm:$0xff] }
 0x1c6   : > { %v694_v31 = vsel %vm616_vm2, %v693_v29, -inf  ;;  %v1296_v30 = vld [vmem:[%s2111_s7 + $0x10] sm:$0xff] }
 0x1c7   : > { %695 = vmax.xlane.f32.xlu0 %v694_v31 }
 0x254   : > { %v696_v32 = vpop.xlane.xlu0 %695 }
 0x255   : > { %v697_v33 = vsub.f32 %v693_v29, %v696_v32  ;;  %v1657_v29 = vpack.c.bf16 %v1295_v28, %v1294_v27 }
 0x257   : > { %v698_v34 = vmul.f32 1.442695, %v697_v33 }
 0x259   : > { %1710 = vpow2.f32 %v698_v34 }
 0x263   : > { %v1711_v35 = vpop.eup %1710 }
 0x264   : > { %v700_v36 = vsel %vm616_vm2, %v1711_v35, 0.0 }
 0x265   : > { %701 = vadd.xlane.f32.xlu0 %v700_v36 }
 0x27b   : > { %947 = vrot.lane.b32.xlu0 %v533_v16, %s1794_s22 }
 0x2f2   : > { %v702_v42 = vpop.xlane.xlu0 %701 }
 0x2f3   : > { %1712 = vrcp.f32 %v702_v42 }
 0x2f6   : > { %v948_v43 = vpop.permute.xlu0 %947 }
 0x2f7   : > { %1608 = vmatpush3.xpose.msk.msra.mxu0 %vm616_vm2, %v948_v43  ;;  %v1512_v43 = vld [vmem:[%s2112_s8] ss:$0 sm:$0xff] }
 0x2f8   : > { %1617 = vmatprep.subr.mxu0 %v1792_v9 }
 0x2fa   : > { %1610 = vmatmul.mubr.msk.f32.vlgmr.msra.gmra.mrb[4].mxu0 %vm616_vm2, %v946_v41 }
 0x2fb   : > { %1618 = vmatpush3.xpose.msk.msra.mxu0 %vm616_vm2, %v1114_v44  ;;  %1619 = vmatprep.mubr.msk.f32.mxu0 %vm1791_vm0, %v1792_v9 }
 0x2fc   : > { %1656 = vmatprep.subr.bf16.mxu0 %v1790_v3 }
 0x2fd   : > { %v1713_v45 = vpop.eup %1712 }
 0x2fe   : > { %v704_v47 = vmul.f32 %v1713_v45, %v1711_v35  ;;  %1620 = vmatmul.mubr.msk.f32.vlgmr.msra.gmra.mrb[6].mxu0 %vm616_vm2, %v1112_v46 }
 0x2ff   : > { %1635 = vmatprep.mubr.msk.f32.mxu0 %vm1791_vm0, %v1792_v9  ;;  %1658 = vmatpush3.bf16.msra.mxu0 %v1657_v29 }
 0x300   : > { %1595 = vmatmul.mubr.msk.f32.vlgmr.msra.gmra.mrb[4].mxu1 %vm616_vm2, %v704_v47  ;;  %1659 = vmatprep.subr.bf16.mxu0 %v1790_v3 }
 0x301   : > { %1598 = vmatpush3.xpose.msk.msra.mxu1 %vm616_vm2, %v781_v39  ;;  %1599 = vmatprep.mubr.msk.f32.mxu1 %vm1791_vm0, %v1792_v9 }
 0x302   : > { %1602 = vmatprep.subr.mxu1 %v1792_v9 }
 0x304   : > { %1600 = vmatmul.mubr.msk.f32.vlgmr.msra.gmra.mrb[6].mxu1 %vm616_vm2, %v779_v40 }
 0x305   : > { %1604 = vmatprep.mubr.msk.f32.mxu1 %vm1791_vm0, %v1792_v9 }
 0x3cd   : > { %v1019_v48 = vpop.f32.mrb[4].mxu0 }
 0x3ce   : > { %v1023_v49 = vsel %vm615_vm3, -1.767767e-13, %v1019_v48  ;;  %v1611_v50 = vpop.f32.mrb[5].mxu0 }
 0x3cf   : > { %v1024_v51 = vsel %vm616_vm2, %v1023_v49, -inf }
 0x3d0   : > { %1025 = vmax.xlane.f32.xlu0 %v1024_v51 }
 0x3d1   : > { %v1185_v52 = vpop.f32.mrb[6].mxu0 }
 0x3d2   : > { %v1621_v53 = vpop.f32.mrb[7].mxu0  ;;  %v1189_v60 = vsel %vm615_vm3, -1.767767e-13, %v1185_v52 }
 0x3d3   : > { %v2013_v54 = vpop.f32.mrb[4].mxu1  ;;  %v1190_v61 = vsel %vm616_vm2, %v1189_v60, -inf }
 0x3d4   : > { %v1596_v55 = vpop.f32.mrb[5].mxu1 }
 0x3d7   : > { %v852_v56 = vpop.f32.mrb[6].mxu1 }
 0x3d8   : > { %v856_v57 = vsel %vm615_vm3, -1.767767e-13, %v852_v56  ;;  %v1601_v58 = vpop.f32.mrb[7].mxu1 }
 0x3d9   : > { %v857_v59 = vsel %vm616_vm2, %v856_v57, -inf }
 0x3da   : > { %858 = vmax.xlane.f32.xlu1 %v857_v59 }
 0x3de   : > { %1191 = vmax.xlane.f32.xlu1 %v1190_v61 }
 0x45d   : > { %v1026_v62 = vpop.xlane.xlu0 %1025 }
 0x45e   : > { %v1027_v63 = vsub.f32 %v1023_v49, %v1026_v62 }
 0x460   : > { %v1028_v0 = vmul.f32 1.442695, %v1027_v63 }
 0x462   : > { %1714 = vpow2.f32 %v1028_v0 }
 0x467   : > { %v859_v1 = vpop.xlane.xlu1 %858 }
 0x468   : > { %v860_v11 = vsub.f32 %v856_v57, %v859_v1 }
 0x46a   : > { %v861_v12 = vmul.f32 1.442695, %v860_v11 }
 0x46b   : > { %v1192_v2 = vpop.xlane.xlu1 %1191 }
 0x46c   : > { %v1715_v4 = vpop.eup %1714  ;;  %v1193_v5 = vsub.f32 %v1189_v60, %v1192_v2 }
 0x46d   : > { %v1030_v6 = vsel %vm616_vm2, %v1715_v4, 0.0 }
 0x46e   : > { %v1194_v7 = vmul.f32 1.442695, %v1193_v5  ;;  %1031 = vadd.xlane.f32.xlu0 %v1030_v6 }
 0x470   : > { %1716 = vpow2.f32 %v1194_v7 }
 0x471   : > { %1718 = vpow2.f32 %v861_v12 }
 0x47a   : > { %v1717_v8 = vpop.eup %1716 }
 0x47b   : > { %v1196_v10 = vsel %vm616_vm2, %v1717_v8, 0.0  ;;  %v1719_v13 = vpop.eup %1718 }
 0x47c   : > { %1197 = vadd.xlane.f32.xlu1 %v1196_v10  ;;  %v863_v14 = vsel %vm616_vm2, %v1719_v13, 0.0 }
 0x484   : > { %869 = vrot.lane.b32.xlu0 %v1988_v37, %s1793_s21 }
 0x48d   : > { %1035 = vrot.lane.b32.xlu1 %v1988_v37, %s1794_s22 }
 0x4b1   : > { %864 = vadd.xlane.f32.xlu1 %v863_v14 }
 0x4c2   : > { %1201 = vrot.lane.b32.xlu1 %v1988_v37, %s2117_s26  ;;  %s360_s26 = sand.u32 1, %s1780_s10  }
 0x4c3   : > { %s1492_s21 = sshll.u32 %s360_s26, 3 }
 0x4c4   : > { %s362_s16 = scalar_lea.vmem [#allocation2], %s1492_s21  ;;  %s1730_s21 = sshll.u32 %s1799_s13, 4  ;;  %s1731_s21 = int_to_ptr.vmem [resolvable:$false] %s1730_s21 }
 0x4c5   : > { %s1393_s17 = sshll.u32 %s362_s16, 4  ;;  %s1732_s22 = scalar_lea.vmem %s1731_s21, 256  ;;  %s2063_s17 = int_to_ptr.vmem [resolvable:$true] %s1393_s17 }
 0x4c6   : > { %p1733_p0 = scmp.lt.s32.totalorder %s2063_s17, %s1731_s21 }
 0x4fb   : > { %v1032_v15 = vpop.xlane.xlu0 %1031 }
 0x4ff   : > { %v870_v16 = vpop.permute.xlu0 %869 }
 0x500   : > { %1603 = vmatpush3.msra.mxu1 %v870_v16 }
 0x501   : > { %1612 = vmatprep.subr.mxu1 %v1792_v9 }
 0x509   : > { %v1198_v17 = vpop.xlane.xlu1 %1197 }
 0x50d   : > { %v1036_v18 = vpop.permute.xlu1 %1035 }
 0x53e   : > { %v865_v19 = vpop.xlane.xlu1 %864 }
 0x53f   : > { %1720 = vrcp.f32 %v865_v19 }
 0x540   : > { %1722 = vrcp.f32 %v1032_v15 }
 0x541   : > { %1724 = vrcp.f32 %v1198_v17 }
 0x542   : > { %v1202_v25 = vpop.permute.xlu1 %1201 }
 0x549   : > { %v1721_v20 = vpop.eup %1720 }
 0x54a   : > { %v867_v21 = vmul.f32 %v1721_v20, %v1719_v13  ;;  %v1723_v22 = vpop.eup %1722 }
 0x54b   : > { %v1034_v23 = vmul.f32 %v1723_v22, %v1715_v4  ;;  %v1725_v24 = vpop.eup %1724 }
 0x54c   : > { %1605 = vmatmul.mubr.msk.f32.vlgmr.msra.gmra.mrb[8].mxu1 %vm616_vm2, %v867_v21  ;;  %v1200_v26 = vmul.f32 %v1725_v24, %v1717_v8 }
 0x54d   : > { %1613 = vmatpush3.msra.mxu1 %v1036_v18  ;;  %1614 = vmatprep.mubr.msk.f32.mxu1 %vm1791_vm0, %v1792_v9 }
 0x54e   : > { %1622 = vmatprep.subr.mxu1 %v1792_v9 }
 0x550   : > { %1615 = vmatmul.mubr.msk.f32.vlgmr.msra.gmra.mrb[10].mxu1 %vm616_vm2, %v1034_v23 }
 0x551   : > { %1623 = vmatpush3.msra.mxu1 %v1202_v25  ;;  %1624 = vmatprep.mubr.msk.f32.mxu1 %vm1791_vm0, %v1792_v9  ;;  %v1297_v9 = vld [vmem:[%s2111_s7 + $0x18] sm:$0xff] }
 0x552   : > { %v1660_v31 = vpack.c.bf16 %v1297_v9, %v1296_v30 }
 0x554   : > { %1625 = vmatmul.mubr.msk.f32.vlgmr.msra.gmra.mrb[12].mxu1 %vm616_vm2, %v1200_v26  ;;  %1661 = vmatpush3.bf16.msra.mxu0 %v1660_v31 }
 0x61f   : > { %v941_v32 = vpop.f32.mrb[8].mxu1 }
 0x620   : > { %1278 = vrot.lane.b32.xlu0 %v941_v32, %s1796_s27  ;;  %v1606_v33 = vpop.f32.mrb[9].mxu1  ;;  %s2061_s27 = scalar_lea.hbm %s2113_s9, %s1515_s14 }
 0x623   : > { %v1107_v34 = vpop.f32.mrb[10].mxu1 }
 0x624   : > { %1282 = vrot.lane.b32.xlu1 %v1107_v34, %s1797_s28  ;;  %v1616_v35 = vpop.f32.mrb[11].mxu1  ;;  %s1380_s28 = scalar_lea.sflag [#allocation3], %s360_s26 }
 0x627   : > { %v1273_v3 = vpop.f32.mrb[12].mxu1 }
 0x628   : > { %1286 = vrot.lane.b32.xlu0 %v1273_v3, %s1798_s29  ;;  %v1626_v36 = vpop.f32.mrb[13].mxu1  ;;  %s1726_s29 = scalar_lea.vmem %s2063_s17, 128 }
 0x629   : > { %p1727_p11 = scmp.ne.s32.totalorder %s2063_s17, %s1726_s29  ;;  %p1734_p1 = scmp.lt.s32.totalorder %s1732_s22, %s1726_s29 }
 0x62b   : > { %p1728_p12 = pnand %p1727_p11, %p1888_p5  ;;  %p1735_p2 = por %p1734_p1, %p1733_p0 }
 0x62d   : > { %p1729_p13 = pneg %p1728_p12 }
 0x62f   : > { %p1736_p3 = pnand %p1735_p2, %p1729_p13 }
 0x692   : > { %v1279_v37 = vpop.permute.xlu0 %1278 }
 0x693   : > { %v1289_v39 = vsel %vm616_vm2, %v2013_v54, %v1279_v37 }
 0x696   : > { %v1283_v38 = vpop.permute.xlu1 %1282 }
 0x697   : > { %v1291_v40 = vsel %vm1290_vm4, %v1289_v39, %v1283_v38 }
 0x69a   : > { %v1287_v41 = vpop.permute.xlu0 %1286 }
 0x69b   : > { %v1293_v42 = vsel %vm1292_vm5, %v1291_v40, %v1287_v41 }
 0x69c   : > { %1636 = vmatmul.mubr.msk.f32.vlgmr.msra.gmra.mrb[8].mxu0 %vm386_vm1, %v1293_v42 }
 0x76f   : > { %v1374_v44 = vpop.f32.mrb[8].mxu0 }
 0x770   : > { %v1375_v45 = vadd.f32 %v1512_v43, %v1374_v44  ;;  %v1637_v46 = vpop.f32.mrb[9].mxu0 }
 0x772   : > { %1378 = vst.msk [vmem:[%s362_s16] sm:$0xff] %vm386_vm1, %v1375_v45 }
 0x773   : > { %1739 = shalt.err (!%p1736_p3)
}
 0x774   : > { %s1740_s26 = scalar_lea.hbm %s2061_s27, 128  ;;  %s1744_s16 = scalar_lea.hbm %s2113_s9, 256 }
 0x775   : > { %p1741_p4 = scmp.ne.s32.totalorder %s2061_s27, %s1740_s26  ;;  %p1745_p9 = scmp.lt.u32.totalorder %s2061_s27, %s2113_s9 }
 0x776   : > { %p1746_p10 = scmp.lt.u32.totalorder %s1744_s16, %s1740_s26  ;;  %p1748_p12 = scmp.lt.u32.totalorder %s1740_s26, %s2061_s27 }
 0x777   : > { %p1742_p7 = pnand %p1741_p4, %p1888_p5 }
 0x778   : > { %p1747_p11 = por %p1746_p10, %p1745_p9 }
 0x779   : > { %p1743_p8 = pneg %p1742_p7 }
 0x77a   : > { %p1749_p13 = por %p1748_p12, %p1747_p11 }
 0x77c   : > { %p1750_p0 = pnand %p1749_p13, %p1743_p8 }
 0x77e   : > { %1753 = shalt.err (!%p1750_p0)
}
 0x77f   : > { %1662 = dma.vmem_to_hbm [thread:$0]  (%p1888_p5), %s2063_s17, 128, %s2061_s27, %s1380_s28  }
 0x780 PF: > { %p1668_p1 = scmp.ge.s32.totalorder %s1788_s12, 2  ;;  %s1405_s29 = sand.u32 1, %s1776_s30  }
 0x781   : > { %s1406_s13 = scalar_lea.sflag [#allocation3], %s1405_s29 }
 0x782   : > { %p1665_p2 = pnand %p1668_p1, %p1892_p6 }
 0x784   : > { %1771 = dma.done.wait (!%p1665_p2), %s1406_s13, 128  }
 0x785   : > { %1773 = vsyncadd (!%p1665_p2), %s1406_s13, 4294967168  ;;  %p19_p3 = scmp.ge.s32.totalorder %s1875_s15, 4   ;;  %s2118_s30 = smov %s1780_s10 }
 0x786   : > { %s2119_s10 = smov %s1784_s11  ;;  %s2120_s11 = smov %s1886_s18 }
 0x787   : > { %s2121_s12 = smov %s1875_s15  ;;  %21 = sbr.rel (!%p19_p3) target bundleno = 3 (0x3), region = 100 }
 0x78e   :  { %1411 = vsyncpa [#allocation3], 1 }
 0x78f   :  { %1413 = vsyncpa [#allocation3 + $0x1], 1 }

</bundles_post_ra>
